<compile_context>
chip_gen: v7x
topology: tpu7x:2x2x1
jax: 0.10.0
libtpu: 0.0.40
codegen_flags: <defaults>
</compile_context>

<pallas_src>
import jax
import jax.numpy as jnp
from jax.experimental import pallas as pl
from jax.experimental.pallas import tpu as pltpu


_VMEM_LIMIT_BYTES = 48 * 1024 * 1024   # safe on v5e/v6e (128 MiB) and v7x (64 MiB physical)
_VMEM_TILE_BUDGET = 40 * 1024 * 1024   # tiling budget with headroom under the limit


def _cdiv(a, b):
    return (a + b - 1) // b


def _round_up(a, b):
    return _cdiv(a, b) * b


# ---------------------------------------------------------------------------
# Kernels
# ---------------------------------------------------------------------------
def _fused_head_kernel(x_ref, w_ref, b_ref, o_ref, acc_ref):
    """o = x @ [W_mu | W_lv]_pad + [b_mu | b_lv]_pad, K-tiled with f32 accumulator."""
    k = pl.program_id(1)

    @pl.when(k == 0)
    def _init():
        acc_ref[...] = jnp.zeros_like(acc_ref)

    acc_ref[...] += jnp.dot(x_ref[...], w_ref[...], preferred_element_type=jnp.float32)

    @pl.when(k == pl.num_programs(1) - 1)
    def _finalize():
        o_ref[...] = (acc_ref[...] + b_ref[...]).astype(o_ref.dtype)


def _split_head_kernel(x_ref, w_ref, bmu_ref, blv_ref, mu_ref, lv_ref, acc_ref):
    """Same single fused matmul, but mu / logvar stored as two lane-dense outputs."""
    k = pl.program_id(1)

    @pl.when(k == 0)
    def _init():
        acc_ref[...] = jnp.zeros_like(acc_ref)

    acc_ref[...] += jnp.dot(x_ref[...], w_ref[...], preferred_element_type=jnp.float32)

    @pl.when(k == pl.num_programs(1) - 1)
    def _finalize():
        cout = mu_ref.shape[-1]
        mu_ref[...] = (acc_ref[:, :cout] + bmu_ref[...]).astype(mu_ref.dtype)
        lv_ref[...] = (acc_ref[:, cout:] + blv_ref[...]).astype(lv_ref.dtype)


# ---------------------------------------------------------------------------
# One-time parameter preparation (hoisted out of the forward pass)
# ---------------------------------------------------------------------------
def prepare_params(w_mu, b_mu, w_lv, b_lv, *, compute_dtype=jnp.float32, out_dtype=None):
    """Fuse/pad the two Linear heads once. w_*: (Cin, Cout) laid out as x @ W; b_*: (1, Cout)."""
    Cin, Cout = w_mu.shape
    out_dtype = compute_dtype if out_dtype is None else out_dtype

    w = jnp.concatenate([jnp.asarray(w_mu), jnp.asarray(w_lv)], axis=1).astype(compute_dtype)
    b_mu = jnp.asarray(b_mu, jnp.float32).reshape(1, Cout)   # bias kept f32 (added to f32 acc)
    b_lv = jnp.asarray(b_lv, jnp.float32).reshape(1, Cout)

    split = (Cout % 128 == 0)
    params = dict(cin=Cin, cout=Cout, split_heads=split,
                  compute_dtype=jnp.dtype(compute_dtype), out_dtype=jnp.dtype(out_dtype))
    if split:
        # Two direct lane-dense outputs; no padding, no post-kernel slice.
        params.update(w=w, b_mu=b_mu, b_lv=b_lv)
    else:
        # Fused + padded output lanes (unmasked vst); sliced back once in the wrapper.
        n = 2 * Cout
        n_pad = _round_up(max(n, 128), 128)
        b = jnp.concatenate([b_mu, b_lv], axis=1)
        if n_pad != n:
            w = jnp.pad(w, ((0, 0), (0, n_pad - n)))
            b = jnp.pad(b, ((0, 0), (0, n_pad - n)))
        params.update(w=w, b=b)
    return params


# ---------------------------------------------------------------------------
# Tiling derivation (VMEM-budget driven, generation-safe)
# ---------------------------------------------------------------------------
def _derive_tiling(B, Cin, n_w, x_itemsize, out_itemsize, budget=_VMEM_TILE_BUDGET):
    sub = 16 if x_itemsize == 2 else 8
    w_itemsize = x_itemsize

    # K (Cin) tiling: keep the fused weight fully VMEM-resident when it fits.
    if Cin * n_w * w_itemsize <= budget // 3 or Cin % 128 != 0:
        tk = Cin
    else:
        tk = 0
        cand = (Cin // 128) * 128
        while cand >= 128:
            if Cin % cand == 0 and 2 * cand * n_w * w_itemsize <= budget // 3:
                tk = cand
                break
            cand -= 128
        if tk == 0:
            tk = Cin  # no clean divisor: fall back to resident weight
    nk = max(1, Cin // tk) if Cin % tk == 0 else 1

    # Batch tile from the remaining VMEM budget.
    w_resident = (1 if nk == 1 else 2) * tk * n_w * w_itemsize
    per_row = 2 * tk * x_itemsize + 2 * n_w * out_itemsize + n_w * 4  # x dbuf + out dbuf + acc
    avail = max(budget - w_resident, per_row * sub)
    tb = (avail // per_row // sub) * sub
    tb = max(sub, min(tb, 2048))
    tb = min(tb, _round_up(B, sub))
    if B >= 2 * sub:
        tb = min(tb, _round_up(_cdiv(B, 2), sub))  # >=2 grid steps -> both v7x TCs engaged
    return tb, tk, nk


# ---------------------------------------------------------------------------
# Forward pass
# ---------------------------------------------------------------------------
def thresholdnet_forward(x, params):
    """x: (B, Cin). Returns (mu, logvar), each (B, Cout) — matches the PyTorch module."""
    B, Cin = x.shape
    assert Cin == params["cin"], "input feature dim mismatch"
    cdtype = params["compute_dtype"]
    odtype = params["out_dtype"]
    if x.dtype != cdtype:
        x = x.astype(cdtype)  # ideally x already arrives in compute_dtype from upstream

    w = params["w"]
    n_w = w.shape[1]
    tb, tk, nk = _derive_tiling(B, Cin, n_w, cdtype.itemsize, odtype.itemsize)
    grid = (pl.cdiv(B, tb), nk)

    x_spec = pl.BlockSpec((tb, tk), lambda i, k: (i, k))
    if nk == 1:
        # Constant index_map: single-buffer the resident fused weight (halves its VMEM cost).
        w_spec = pl.BlockSpec((tk, n_w), lambda i, k: (0, 0), pipeline_mode=pl.Buffered(1))
    else:
        w_spec = pl.BlockSpec((tk, n_w), lambda i, k: (k, 0))  # streamed over K, double-buffered

    cparams = pltpu.CompilerParams(
        dimension_semantics=("parallel", "arbitrary"),
        vmem_limit_bytes=_VMEM_LIMIT_BYTES,
    )
    acc = pltpu.VMEM((tb, n_w), jnp.float32)

    if params["split_heads"]:
        cout = params["cout"]
        b_spec = pl.BlockSpec((1, cout), lambda i, k: (0, 0), pipeline_mode=pl.Buffered(1))
        out_spec = pl.BlockSpec((tb, cout), lambda i, k: (i, 0))
        mu, logvar = pl.pallas_call(
            _split_head_kernel,
            out_shape=(jax.ShapeDtypeStruct((B, cout), odtype),
                       jax.ShapeDtypeStruct((B, cout), odtype)),
            grid=grid,
            in_specs=[x_spec, w_spec, b_spec, b_spec],
            out_specs=(out_spec, out_spec),
            scratch_shapes=[acc],
            compiler_params=cparams,
        )(x, w, params["b_mu"], params["b_lv"])
        return mu, logvar

    cout = params["cout"]
    b_spec = pl.BlockSpec((1, n_w), lambda i, k: (0, 0), pipeline_mode=pl.Buffered(1))
    out = pl.pallas_call(
        _fused_head_kernel,
        out_shape=jax.ShapeDtypeStruct((B, n_w), odtype),
        grid=grid,
        in_specs=[x_spec, w_spec, b_spec],
        out_specs=pl.BlockSpec((tb, n_w), lambda i, k: (i, 0)),
        scratch_shapes=[acc],
        compiler_params=cparams,
    )(x, w, params["b"])
    # Module contract requires two arrays; 2*Cout is not lane-aligned here, so one cheap slice each.
    return out[:, :cout], out[:, cout:2 * cout]


# ---------------------------------------------------------------------------
# Deterministic init mimicking nn.Linear's uniform(-1/sqrt(fan_in), +1/sqrt(fan_in))
# ---------------------------------------------------------------------------
def init_params(key, input_channels, output_channels, dtype=jnp.float32):
    k1, k2, k3, k4 = jax.random.split(key, 4)
    bound = 1.0 / jnp.sqrt(jnp.array(input_channels, dtype))
    # Stored pre-transposed: (in, out) so the kernel does x @ W directly.
    w_mu = jax.random.uniform(k1, (input_channels, output_channels), dtype, -bound, bound)
    b_mu = jax.random.uniform(k2, (1, output_channels), dtype, -bound, bound)
    w_lv = jax.random.uniform(k3, (input_channels, output_channels), dtype, -bound, bound)
    b_lv = jax.random.uniform(k4, (1, output_channels), dtype, -bound, bound)
    return w_mu, b_mu, w_lv, b_lv


if __name__ == "__main__":
    key = jax.random.PRNGKey(0)
    k_x1, k_p1, k_x2, k_p2 = jax.random.split(key, 4)

    # --- Case 1: small Cout -> fused padded-output path, f32 compute, tight check.
    B1, Cin1, Cout1 = 8, 32, 32
    x1 = jax.random.normal(k_x1, (B1, Cin1), jnp.float32)
    w_mu1, b_mu1, w_lv1, b_lv1 = init_params(k_p1, Cin1, Cout1)
    params1 = prepare_params(w_mu1, b_mu1, w_lv1, b_lv1, compute_dtype=jnp.float32)
    mu1, lv1 = jax.block_until_ready(thresholdnet_forward(x1, params1))
    mu1_ref = x1 @ w_mu1 + b_mu1
    lv1_ref = x1 @ w_lv1 + b_lv1
    assert mu1.shape == (B1, Cout1) and lv1.shape == (B1, Cout1)
    assert jnp.allclose(mu1, mu1_ref, atol=1e-5, rtol=1e-5)
    assert jnp.allclose(lv1, lv1_ref, atol=1e-5, rtol=1e-5)

    # --- Case 2: Cout % 128 == 0 -> two direct lane-dense outputs, bf16 compute path.
    B2, Cin2, Cout2 = 16, 64, 128
    x2 = jax.random.normal(k_x2, (B2, Cin2), jnp.float32)
    w_mu2, b_mu2, w_lv2, b_lv2 = init_params(k_p2, Cin2, Cout2)
    params2 = prepare_params(w_mu2, b_mu2, w_lv2, b_lv2,
                             compute_dtype=jnp.bfloat16, out_dtype=jnp.float32)
    mu2, lv2 = jax.block_until_ready(thresholdnet_forward(x2, params2))
    mu2_ref = x2 @ w_mu2 + b_mu2
    lv2_ref = x2 @ w_lv2 + b_lv2
    assert mu2.shape == (B2, Cout2) and lv2.shape == (B2, Cout2)
    assert jnp.allclose(mu2, mu2_ref, atol=5e-2, rtol=5e-2)   # bf16 input rounding
    assert jnp.allclose(lv2, lv2_ref, atol=5e-2, rtol=5e-2)

    print("KERNEL_OK")
</pallas_src>

<mosaic_0001>
module attributes {stable_mosaic.version = 11 : i64} {
  func.func @_fused_head_kernel(%arg0: i32, %arg1: i32, %arg2: memref<8x32xf32, #tpu.memory_space<vmem>>, %arg3: memref<32x128xf32, #tpu.memory_space<vmem>>, %arg4: memref<1x128xf32, #tpu.memory_space<vmem>>, %arg5: memref<8x128xf32, #tpu.memory_space<vmem>>, %arg6: memref<8x128xf32, #tpu.memory_space<vmem>>) attributes {dimension_semantics = [#tpu.dimension_semantics<parallel>, #tpu.dimension_semantics<arbitrary>], iteration_bounds = array<i64: 1, 1>, scalar_prefetch = 0 : i64, scratch_operands = 1 : i64, tpu.core_type = #tpu.core_type<tc>, window_params = [{transform_indices = @transform_0, window_bounds = array<i64: 8, 32>}, {pipeline_mode = #tpu.pipeline_mode<synchronous>, transform_indices = @transform_1, window_bounds = array<i64: 32, 128>}, {pipeline_mode = #tpu.pipeline_mode<synchronous>, transform_indices = @transform_2, window_bounds = array<i64: 1, 128>}, {transform_indices = @transform_3, window_bounds = array<i64: 8, 128>}]} {
    %c0_i32 = arith.constant 0 : i32
    %0 = arith.cmpi eq, %arg1, %c0_i32 : i32
    %1 = arith.extui %0 : i1 to i32
    %c0_i32_0 = arith.constant 0 : i32
    %2 = arith.cmpi ne, %1, %c0_i32_0 : i32
    scf.if %2 {
      %cst_10 = arith.constant 0.000000e+00 : f32
      %12 = vector.broadcast %cst_10 : f32 to vector<8x128xf32>
      %c0_11 = arith.constant 0 : index
      %c0_12 = arith.constant 0 : index
      %13 = vector.load %arg6[%c0_11, %c0_12] : memref<8x128xf32, #tpu.memory_space<vmem>>, vector<8x128xf32>
      tpu.vector_store %arg6[%c0_11, %c0_12], %12 {strides = array<i32>} : memref<8x128xf32, #tpu.memory_space<vmem>>, vector<8x128xf32>,
    } else {
    }
    %c0 = arith.constant 0 : index
    %c0_1 = arith.constant 0 : index
    %3 = vector.load %arg6[%c0, %c0_1] : memref<8x128xf32, #tpu.memory_space<vmem>>, vector<8x128xf32>
    %c0_2 = arith.constant 0 : index
    %c0_3 = arith.constant 0 : index
    %4 = vector.load %arg2[%c0_2, %c0_3] : memref<8x32xf32, #tpu.memory_space<vmem>>, vector<8x32xf32>
    %c0_4 = arith.constant 0 : index
    %c0_5 = arith.constant 0 : index
    %5 = vector.load %arg3[%c0_4, %c0_5] : memref<32x128xf32, #tpu.memory_space<vmem>>, vector<32x128xf32>
    %cst = arith.constant dense<0.000000e+00> : vector<8x128xf32>
    %6 = tpu.matmul %4, %5, %cst {dimension_numbers = #tpu.dot_dimension_numbers<[1], [0], [0], [1], [0, 0, 1, 1], [], []>} : vector<8x32xf32>, vector<32x128xf32>, vector<8x128xf32> -> vector<8x128xf32>
    %7 = arith.addf %3, %6 : vector<8x128xf32>
    %c0_6 = arith.constant 0 : index
    %c0_7 = arith.constant 0 : index
    %8 = vector.load %arg6[%c0_6, %c0_7] : memref<8x128xf32, #tpu.memory_space<vmem>>, vector<8x128xf32>
    tpu.vector_store %arg6[%c0_6, %c0_7], %7 {strides = array<i32>} : memref<8x128xf32, #tpu.memory_space<vmem>>, vector<8x128xf32>,
    %c0_i32_8 = arith.constant 0 : i32
    %9 = arith.cmpi eq, %arg1, %c0_i32_8 : i32
    %10 = arith.extui %9 : i1 to i32
    %c0_i32_9 = arith.constant 0 : i32
    %11 = arith.cmpi ne, %10, %c0_i32_9 : i32
    scf.if %11 {
      %c0_10 = arith.constant 0 : index
      %c0_11 = arith.constant 0 : index
      %12 = vector.load %arg6[%c0_10, %c0_11] : memref<8x128xf32, #tpu.memory_space<vmem>>, vector<8x128xf32>
      %c0_12 = arith.constant 0 : index
      %c0_13 = arith.constant 0 : index
      %13 = vector.load %arg4[%c0_12, %c0_13] : memref<1x128xf32, #tpu.memory_space<vmem>>, vector<1x128xf32>
      %14 = vector.broadcast %13 : vector<1x128xf32> to vector<8x128xf32>
      %15 = arith.addf %12, %14 : vector<8x128xf32>
      %c0_14 = arith.constant 0 : index
      %c0_15 = arith.constant 0 : index
      %16 = vector.load %arg5[%c0_14, %c0_15] : memref<8x128xf32, #tpu.memory_space<vmem>>, vector<8x128xf32>
      tpu.vector_store %arg5[%c0_14, %c0_15], %15 {strides = array<i32>} : memref<8x128xf32, #tpu.memory_space<vmem>>, vector<8x128xf32>,
    } else {
    }
    return
  }
  func.func @transform_0(%arg0: i32, %arg1: i32) -> (i32, i32) {
    %c0_i32 = arith.constant 0 : i32
    return %arg0, %arg1 : i32, i32
  }
  func.func @transform_1(%arg0: i32, %arg1: i32) -> (i32, i32) {
    %c0_i32 = arith.constant 0 : i32
    %c0_i32_0 = arith.constant 0 : i32
    %c0_i32_1 = arith.constant 0 : i32
    return %c0_i32, %c0_i32_0 : i32, i32
  }
  func.func @transform_2(%arg0: i32, %arg1: i32) -> (i32, i32) {
    %c0_i32 = arith.constant 0 : i32
    %c0_i32_0 = arith.constant 0 : i32
    %c0_i32_1 = arith.constant 0 : i32
    return %c0_i32, %c0_i32_0 : i32, i32
  }
  func.func @transform_3(%arg0: i32, %arg1: i32) -> (i32, i32) {
    %c0_i32 = arith.constant 0 : i32
    %c0_i32_0 = arith.constant 0 : i32
    return %arg0, %c0_i32 : i32, i32
  }
}

</mosaic_0001>

<bundles_post_ra>
// kernel: tpu_custom_call.1
= control target key start
LH: loop header
LB: loop body
LE: loop exit
PB: predicated region body
PF: predicated region fallthrough
CT: control target
= control target key end

     0   :  { %8 = vsyncpa [#allocation4], 0  ;;  %s335_s0 = inlined_call_operand.hbm [shape: f32[8,32], index: 0, kind: input, shape index: {}]   ;;  %s336_s1 = inlined_call_operand.hbm [shape: f32[32,128], index: 1, kind: input, shape index: {}]   ;;  %s337_s2 = inlined_call_operand.vmem [shape: f32[1,128], index: 2, kind: input, shape index: {}]   ;;  %s338_s3 = inlined_call_operand.hbm [shape: f32[8,128], index: 3, kind: output, shape index: {}]  }
   0x1   :  { %9 = vsyncpa [#allocation7], 0 }
   0x2   :  { %10 = vsyncpa [#allocation5], 0  ;;  %s261_s12 = smov [#allocation3]   ;;  %s262_s14 = smov [#allocation6]  }
   0x3   :  { %s17_s13 = sshll.u32 %s261_s12, 4  ;;  %s26_s15 = sshll.u32 %s262_s14, 4  ;;  %s18_s13 = int_to_ptr.vmem [resolvable:$true] %s17_s13  ;;  %s289_s15 = int_to_ptr.vmem [resolvable:$true] %s26_s15 }
   0x4   :  { %s189_s18 = scalar_lea.hbm %s335_s0, 128 }
   0x5   :  { %p190_p0 = scmp.ne.s32.totalorder %s335_s0, %s189_s18  ;;  %p193_p1 = scmp.lt.u32.totalorder %s189_s18, %s335_s0 }
   0x7   :  { %p195_p2 = pnand %p193_p1, %p190_p0 }
   0x9   :  { %198 = shalt.err (!%p195_p2)
}
   0xa   :  { %s199_s23 = scalar_lea.vmem %s18_s13, 128  ;;  %p204_p4 = scmp.lt.s32.totalorder %s18_s13, %s18_s13 }
   0xb   :  { %p200_p3 = scmp.ne.s32.totalorder %s18_s13, %s199_s23  ;;  %p205_p5 = scmp.lt.s32.totalorder %s199_s23, %s199_s23 }
   0xd   :  { %p206_p6 = por %p205_p5, %p204_p4 }
   0xf   :  { %p207_p7 = pnand %p206_p6, %p200_p3 }
  0x11   :  { %210 = shalt.err (!%p207_p7)
}
  0x12   :  { %20 = dma.hbm_to_vmem [thread:$0]  %s335_s0, 128, %s18_s13, [#allocation4]  }
  0x13   :  { %s211_s28 = scalar_lea.hbm %s336_s1, 512 }
  0x14   :  { %p212_p8 = scmp.ne.s32.totalorder %s336_s1, %s211_s28  ;;  %p215_p9 = scmp.lt.u32.totalorder %s211_s28, %s336_s1 }
  0x16   :  { %p217_p10 = pnand %p215_p9, %p212_p8 }
  0x18   :  { %220 = shalt.err (!%p217_p10)
}
  0x19   :  { %s221_s6 = scalar_lea.vmem %s289_s15, 512  ;;  %p226_p12 = scmp.lt.s32.totalorder %s289_s15, %s289_s15 }
  0x1a   :  { %p222_p11 = scmp.ne.s32.totalorder %s289_s15, %s221_s6  ;;  %p227_p13 = scmp.lt.s32.totalorder %s221_s6, %s221_s6 }
  0x1c   :  { %p228_p0 = por %p227_p13, %p226_p12 }
  0x1e   :  { %p229_p1 = pnand %p228_p0, %p222_p11 }
  0x20   :  { %232 = shalt.err (!%p229_p1)
}
  0x21   :  { %s263_s0 = smov 128   ;;  %s264_s7 = smov 8  }
  0x22   :  { %32 = dma.hbm_to_vmem [thread:$0]  %s336_s1, 512, %s289_s15, [#allocation7], %s263_s0, %s263_s0, %s264_s7  }
  0x23   :  { %255 = dma.done.wait [#allocation4], 128  }
  0x24   :  { %256 = vsyncadd [#allocation4], 4294967168 }
  0x25   :  { %257 = dma.done.wait [#allocation7], 512  }
  0x26   :  { %258 = vsyncadd [#allocation7], 4294966784  ;;  %v265_v0 = vmov 0.0|0.0   ;;  %vm266_vm0 = vmmov 0   ;;  %v267_v1 = vmov 0.0   ;;  %v48_v2 = vld [vmem:[#allocation6] sm:$0xff] }
  0x27   :  { %175 = vmatprep.subr.bf16.mxu0 %v265_v0  ;;  %172 = vmatprep.mubr.msk.f32.mxu0 %vm266_vm0, %v267_v1  ;;  %v49_v3 = vld [vmem:[#allocation6 + $0x8] sm:$0xff]  ;;  %v50_v4 = vld [vmem:[#allocation6 + $0x10] sm:$0xff]  ;;  %v51_v6 = vld [vmem:[#allocation6 + $0x18] sm:$0xff]  ;;  %vm52_vm1 = vcmask 261120   ;;  %s268_s11 = smov [#allocation8]  }
  0x28   :  { %v176_v5 = vpack.c.bf16 %v49_v3, %v48_v2  ;;  %v179_v7 = vpack.c.bf16 %v51_v6, %v50_v4  ;;  %v47_v8 = vld [vmem:[#allocation3] sm:$0xff]  ;;  %s147_s12 = sshll.u32 %s268_s11, 4  ;;  %s148_s12 = int_to_ptr.vmem [resolvable:$true] %s147_s12 }
  0x29   :  { %v158_v9 = vld [vmem:[%s337_s2] ss:$0 sm:$0xff]  ;;  %s233_s13 = scalar_lea.vmem %s148_s12, 128  ;;  %p238_p3 = scmp.lt.s32.totalorder %s148_s12, %s148_s12 }
  0x2a   :  { %177 = vmatpush3.bf16.msra.mxu0 %v176_v5  ;;  %p234_p2 = scmp.ne.s32.totalorder %s148_s12, %s233_s13  ;;  %p239_p4 = scmp.lt.s32.totalorder %s233_s13, %s233_s13 }
  0x2b   :  { %178 = vmatprep.subr.bf16.mxu0 %v265_v0 }
  0x2c   :  { %p240_p5 = por %p239_p4, %p238_p3 }
  0x2e   :  { %180 = vmatpush3.bf16.msra.mxu0 %v179_v7  ;;  %p241_p6 = pnand %p240_p5, %p234_p2 }
  0x31   :  { %173 = vmatmul.mubr.msk.f32.vlgmr.msra.gmra.mrb[0].mxu0 %vm52_vm1, %v47_v8 }
 0x104   :  { %v122_v10 = vpop.f32.mrb[0].mxu0 }
 0x105   :  { %v139_v11 = vadd.f32 %v158_v9, %v122_v10  ;;  %v174_v12 = vpop.f32.mrb[1].mxu0 }
 0x107   :  { %140 = vst [vmem:[#allocation8] sm:$0xff] %v139_v11 }
 0x108   :  { %244 = shalt.err (!%p241_p6)
}
 0x109   :  { %s245_s16 = scalar_lea.hbm %s338_s3, 128 }
 0x10a   :  { %p246_p7 = scmp.ne.s32.totalorder %s338_s3, %s245_s16  ;;  %p249_p8 = scmp.lt.u32.totalorder %s245_s16, %s338_s3 }
 0x10c   :  { %p251_p9 = pnand %p249_p8, %p246_p7 }
 0x10e   :  { %254 = shalt.err (!%p251_p9)
}
 0x10f   :  { %150 = dma.vmem_to_hbm [thread:$0]  %s148_s12, 128, %s338_s3, [#allocation5]  }
 0x110   :  { %259 = dma.done.wait [#allocation5], 128  }
 0x111   :  { %260 = vsyncadd [#allocation5], 4294967168 }
 0x112   :  { %154 = vsyncpa [#allocation4], 1 }
 0x113   :  { %155 = vsyncpa [#allocation7], 1 }
 0x114   :  { %156 = vsyncpa [#allocation5], 1 }

</bundles_post_ra>
